<compile_context>
chip_gen: v7x
topology: tpu7x:2x2x1
jax: 0.10.0
libtpu: 0.0.40
codegen_flags: <defaults>
</compile_context>

<pallas_src>
import math

import jax
import jax.numpy as jnp
from jax.experimental import pallas as pl
from jax.experimental.pallas import tpu as pltpu


def _round_up(x, m):
    return (x + m - 1) // m * m


def _pick_tiles(n):
    """Pick (n_pad, row_tile, k_tile) for the adj/output tiling."""
    n_pad = _round_up(n, 128)
    if n >= 2048:
        # bigger tiles -> better HBM roofline; padding overhead is small here
        n_pad = _round_up(n, 512)
    tm = next(t for t in (256, 128) if n_pad % t == 0)
    tk = next(t for t in (512, 256, 128) if n_pad % t == 0)
    return n_pad, tm, tk


# ---------------- pass 1: support = x @ weight (row-tiled) -----------------

def _support_kernel(x_ref, w_ref, s_ref):
    s_ref[...] = jnp.dot(
        x_ref[...], w_ref[...], preferred_element_type=jnp.float32
    ).astype(s_ref.dtype)


# -------- pass 2: adj-aggregate + concat(mask) + bias + ReLU ---------------

def _make_combine_kernel(split, split_pad, out_f_pad):
    def kernel(adj_ref, sup_rhs_ref, sup_pass_ref, b_ref, o_ref, acc_ref):
        k = pl.program_id(1)

        @pl.when(k == 0)
        def _():
            acc_ref[...] = jnp.zeros_like(acc_ref)

        # only the kept (128-aligned) column slab of support is aggregated
        acc_ref[...] += jnp.dot(
            adj_ref[...], sup_rhs_ref[...], preferred_element_type=jnp.float32
        )

        @pl.when(k == pl.num_programs(1) - 1)
        def _():
            sup = sup_pass_ref[...].astype(jnp.float32)
            b = b_ref[...].astype(jnp.float32)
            # concat([agg[:, :split], support[:, split:]]) via a column mask
            # inside the 128-aligned left slab; right slab is pure passthrough.
            col = jax.lax.broadcasted_iota(jnp.int32, acc_ref.shape, 1)
            left = jnp.where(col < split, acc_ref[...], sup[:, :split_pad])
            left = jnp.maximum(left + b[:, :split_pad], 0.0)
            o_ref[:, :split_pad] = left.astype(o_ref.dtype)
            if split_pad < out_f_pad:
                right = jnp.maximum(sup[:, split_pad:] + b[:, split_pad:], 0.0)
                o_ref[:, split_pad:] = right.astype(o_ref.dtype)

    return kernel


# ------------- split == 0 path: no aggregation at all ----------------------

def _dense_relu_kernel(x_ref, w_ref, b_ref, o_ref):
    y = jnp.dot(x_ref[...], w_ref[...], preferred_element_type=jnp.float32)
    y = y + b_ref[...].astype(jnp.float32)
    o_ref[...] = jnp.maximum(y, 0.0).astype(o_ref.dtype)


# ---------------------------- wrapper ---------------------------------------

def zeron_gcn_forward(x, adj, weight, bias, *, compute_dtype=jnp.bfloat16):
    """x: (N, in_f), adj: (N, N), weight: (in_f, out_f), bias: (out_f,)."""
    n, in_f = x.shape
    out_f = weight.shape[1]
    split = out_f // 10

    out_f_pad = _round_up(out_f, 128)
    n_pad, tm, tk = _pick_tiles(n)

    # pad + cast operands (MXU operands in compute_dtype, bias/epilogue in f32)
    x_p = jnp.pad(x.astype(compute_dtype), ((0, n_pad - n), (0, 0)))
    w_p = jnp.pad(weight.astype(compute_dtype), ((0, 0), (0, out_f_pad - out_f)))
    b_p = jnp.pad(bias.reshape(1, out_f).astype(jnp.float32),
                  ((0, 0), (0, out_f_pad - out_f)))

    num_i = n_pad // tm

    if split == 0:
        # out_f < 10: aggregation result is fully discarded -> skip adj matmul
        out = pl.pallas_call(
            _dense_relu_kernel,
            out_shape=jax.ShapeDtypeStruct((n_pad, out_f_pad), jnp.float32),
            grid_spec=pltpu.PrefetchScalarGridSpec(
                num_scalar_prefetch=0,
                grid=(num_i,),
                in_specs=[
                    pl.BlockSpec((tm, in_f), lambda i: (i, 0)),
                    pl.BlockSpec((in_f, out_f_pad), lambda i: (0, 0)),
                    pl.BlockSpec((1, out_f_pad), lambda i: (0, 0)),
                ],
                out_specs=pl.BlockSpec((tm, out_f_pad), lambda i: (i, 0)),
            ),
            compiler_params=pltpu.CompilerParams(
                dimension_semantics=("parallel",)),
        )(x_p, w_p, b_p)
        return out[:n, :out_f]

    split_pad = min(_round_up(split, 128), out_f_pad)
    adj_p = jnp.pad(adj.astype(compute_dtype),
                    ((0, n_pad - n), (0, n_pad - n)))

    # ---- pass 1: support = x @ W -------------------------------------------
    support = pl.pallas_call(
        _support_kernel,
        out_shape=jax.ShapeDtypeStruct((n_pad, out_f_pad), compute_dtype),
        grid_spec=pltpu.PrefetchScalarGridSpec(
            num_scalar_prefetch=0,
            grid=(num_i,),
            in_specs=[
                pl.BlockSpec((tm, in_f), lambda i: (i, 0)),
                pl.BlockSpec((in_f, out_f_pad), lambda i: (0, 0)),
            ],
            out_specs=pl.BlockSpec((tm, out_f_pad), lambda i: (i, 0)),
        ),
        compiler_params=pltpu.CompilerParams(
            dimension_semantics=("parallel",)),
    )(x_p, w_p)

    # ---- pass 2: tiled adj @ support[:, :split_pad] + fused epilogue -------
    num_k = n_pad // tk
    kernel = _make_combine_kernel(split, split_pad, out_f_pad)
    out = pl.pallas_call(
        kernel,
        out_shape=jax.ShapeDtypeStruct((n_pad, out_f_pad), jnp.float32),
        grid_spec=pltpu.PrefetchScalarGridSpec(
            num_scalar_prefetch=0,
            grid=(num_i, num_k),
            in_specs=[
                # adj tile for (row block i, reduction block k)
                pl.BlockSpec((tm, tk), lambda i, k: (i, k)),
                # support rows k, only the kept 128-aligned column slab (RHS)
                pl.BlockSpec((tk, split_pad), lambda i, k: (k, 0)),
                # support rows i (passthrough columns), resident across k
                pl.BlockSpec((tm, out_f_pad), lambda i, k: (i, 0)),
                # bias (broadcast)
                pl.BlockSpec((1, out_f_pad), lambda i, k: (0, 0)),
            ],
            out_specs=pl.BlockSpec((tm, out_f_pad), lambda i, k: (i, 0)),
            scratch_shapes=[pltpu.VMEM((tm, split_pad), jnp.float32)],
        ),
        compiler_params=pltpu.CompilerParams(
            dimension_semantics=("parallel", "arbitrary")),
    )(adj_p, support, support, b_p)

    return out[:n, :out_f]


def init_params(key, in_features, out_features):
    """Deterministic init matching ZERON_GCN.reset_parameters."""
    stdv = 6.0 / math.sqrt(out_features + in_features)
    wkey, _ = jax.random.split(key)
    weight = jax.random.uniform(
        wkey, (in_features, out_features), dtype=jnp.float32,
        minval=-stdv, maxval=stdv)
    # bias.uniform_(-0, 0) -> zeros
    bias = jnp.zeros((out_features,), dtype=jnp.float32)
    return weight, bias


if __name__ == "__main__":
    key = jax.random.PRNGKey(0)
    k_x, k_adj, k_p = jax.random.split(key, 3)

    N, IN_F, OUT_F = 64, 32, 64  # small graph: 64 nodes

    x = jax.random.normal(k_x, (N, IN_F), dtype=jnp.float32)
    # simple symmetric row-normalized-ish adjacency (dense, deterministic)
    a = jax.random.uniform(k_adj, (N, N), dtype=jnp.float32)
    adj = (a + a.T) / (2.0 * N)

    weight, bias = init_params(k_p, IN_F, OUT_F)

    # plain-JAX reference (same math as the PyTorch forward, ReLU activation)
    support = x @ weight
    s = OUT_F // 10
    ref = jnp.concatenate([adj @ support[:, :s], support[:, s:]], axis=1) + bias
    ref = jnp.maximum(ref, 0.0)

    # exact path: f32 MXU operands -> tight tolerance
    out_f32 = zeron_gcn_forward(x, adj, weight, bias,
                                compute_dtype=jnp.float32)
    jax.block_until_ready(out_f32)
    assert out_f32.shape == ref.shape
    assert jnp.allclose(out_f32, ref, atol=1e-4, rtol=1e-4), \
        "f32 mismatch vs reference"

    # fast default path: bf16 MXU operands, f32 accumulation + epilogue
    out_bf16 = zeron_gcn_forward(x, adj, weight, bias)
    jax.block_until_ready(out_bf16)
    assert jnp.allclose(out_bf16, ref, atol=5e-2, rtol=5e-2), \
        "bf16 mismatch vs reference"

    print("KERNEL_OK")
</pallas_src>

<mosaic_0001>
module attributes {stable_mosaic.version = 11 : i64} {
  func.func @_support_kernel(%arg0: i32, %arg1: memref<128x32xf32, #tpu.memory_space<vmem>>, %arg2: memref<32x128xf32, #tpu.memory_space<vmem>>, %arg3: memref<128x128xf32, #tpu.memory_space<vmem>>) attributes {dimension_semantics = [#tpu.dimension_semantics<parallel>], iteration_bounds = array<i64: 1>, scalar_prefetch = 0 : i64, scratch_operands = 0 : i64, tpu.core_type = #tpu.core_type<tc>, window_params = [{transform_indices = @transform_0, window_bounds = array<i64: 128, 32>}, {pipeline_mode = #tpu.pipeline_mode<synchronous>, transform_indices = @transform_1, window_bounds = array<i64: 32, 128>}, {transform_indices = @transform_2, window_bounds = array<i64: 128, 128>}]} {
    %c0 = arith.constant 0 : index
    %c0_0 = arith.constant 0 : index
    %0 = vector.load %arg1[%c0, %c0_0] : memref<128x32xf32, #tpu.memory_space<vmem>>, vector<128x32xf32>
    %c0_1 = arith.constant 0 : index
    %c0_2 = arith.constant 0 : index
    %1 = vector.load %arg2[%c0_1, %c0_2] : memref<32x128xf32, #tpu.memory_space<vmem>>, vector<32x128xf32>
    %cst = arith.constant dense<0.000000e+00> : vector<128x128xf32>
    %2 = tpu.matmul %0, %1, %cst {dimension_numbers = #tpu.dot_dimension_numbers<[1], [0], [0], [1], [0, 0, 1, 1], [], []>} : vector<128x32xf32>, vector<32x128xf32>, vector<128x128xf32> -> vector<128x128xf32>
    %c0_3 = arith.constant 0 : index
    %c0_4 = arith.constant 0 : index
    %3 = vector.load %arg3[%c0_3, %c0_4] : memref<128x128xf32, #tpu.memory_space<vmem>>, vector<128x128xf32>
    tpu.vector_store %arg3[%c0_3, %c0_4], %2 {strides = array<i32>} : memref<128x128xf32, #tpu.memory_space<vmem>>, vector<128x128xf32>,
    return
  }
  func.func @transform_0(%arg0: i32) -> (i32, i32) {
    %c0_i32 = arith.constant 0 : i32
    %c0_i32_0 = arith.constant 0 : i32
    return %arg0, %c0_i32 : i32, i32
  }
  func.func @transform_1(%arg0: i32) -> (i32, i32) {
    %c0_i32 = arith.constant 0 : i32
    %c0_i32_0 = arith.constant 0 : i32
    %c0_i32_1 = arith.constant 0 : i32
    return %c0_i32, %c0_i32_0 : i32, i32
  }
  func.func @transform_2(%arg0: i32) -> (i32, i32) {
    %c0_i32 = arith.constant 0 : i32
    %c0_i32_0 = arith.constant 0 : i32
    return %arg0, %c0_i32 : i32, i32
  }
}

</mosaic_0001>

<bundles_post_ra>
// kernel: tpu_custom_call.1
= control target key start
LH: loop header
LB: loop body
LE: loop exit
PB: predicated region body
PF: predicated region fallthrough
CT: control target
= control target key end

     0   :  { %vm32_vm0 = vcmask 261120   ;;  %s471_s0 = inlined_call_operand.vmem [shape: f32[128,32], index: 0, kind: input, shape index: {}]   ;;  %s472_s1 = inlined_call_operand.vmem [shape: f32[32,128], index: 1, kind: input, shape index: {}]   ;;  %s473_s2 = inlined_call_operand.hbm [shape: f32[128,128], index: 2, kind: output, shape index: {}]  }
   0x1   :  { %v28_v0 = vld [vmem:[%s472_s1] sm:$0xff]  ;;  %v29_v1 = vld [vmem:[%s472_s1 + $0x8] sm:$0xff]  ;;  %v30_v2 = vld [vmem:[%s472_s1 + $0x10] sm:$0xff] }
   0x2   :  { %v326_v3 = vpack.c.bf16 %v29_v1, %v28_v0  ;;  %v31_v4 = vld [vmem:[%s472_s1 + $0x18] sm:$0xff]  ;;  %v12_v5 = vld [vmem:[%s471_s0] sm:$0xff] }
   0x3   :  { %v20_v6 = vld [vmem:[%s471_s0 + $0x40] sm:$0xff]  ;;  %v330_v7 = vpack.c.bf16 %v31_v4, %v30_v2  ;;  %302 = vmatprep.mubr.msk.f32.mxu0 %vm32_vm0, %v12_v5 }
   0x4   :  { %314 = vmatprep.mubr.msk.f32.mxu1 %vm32_vm0, %v20_v6  ;;  %327 = vmatprep.subr.bf16.mxu0 %v326_v3 }
   0x5   :  { %334 = vmatprep.subr.bf16.mxu1 %v326_v3  ;;  %329 = vmatpush3.bf16.msra.mxu0 %v326_v3 }
   0x6   :  { %336 = vmatpush3.bf16.msra.mxu1 %v326_v3  ;;  %331 = vmatprep.subr.bf16.mxu0 %v330_v7 }
   0x7   :  { %335 = vmatprep.subr.bf16.mxu1 %v330_v7 }
   0x8   :  { %7 = vsyncpa [#allocation3], 0  ;;  %v13_v8 = vld [vmem:[%s471_s0 + $0x8] sm:$0xff]  ;;  %v14_v10 = vld [vmem:[%s471_s0 + $0x10] sm:$0xff] }
   0x9   :  { %333 = vmatpush3.bf16.msra.mxu0 %v330_v7  ;;  %v21_v9 = vld [vmem:[%s471_s0 + $0x48] sm:$0xff]  ;;  %v22_v11 = vld [vmem:[%s471_s0 + $0x50] sm:$0xff]  ;;  %v15_v12 = vld [vmem:[%s471_s0 + $0x18] sm:$0xff] }
   0xa   :  { %337 = vmatpush3.bf16.msra.mxu1 %v330_v7  ;;  %v23_v13 = vld [vmem:[%s471_s0 + $0x58] sm:$0xff]  ;;  %v16_v14 = vld [vmem:[%s471_s0 + $0x20] sm:$0xff]  ;;  %v17_v16 = vld [vmem:[%s471_s0 + $0x28] sm:$0xff] }
   0xb   :  { %v24_v15 = vld [vmem:[%s471_s0 + $0x60] sm:$0xff]  ;;  %v25_v17 = vld [vmem:[%s471_s0 + $0x68] sm:$0xff]  ;;  %v18_v18 = vld [vmem:[%s471_s0 + $0x30] sm:$0xff] }
   0xc   :  { %303 = vmatmul.mubr.msk.f32.vlgmr.msra.gmra.mrb[0].mxu0 %vm32_vm0, %v13_v8  ;;  %v26_v19 = vld [vmem:[%s471_s0 + $0x70] sm:$0xff]  ;;  %v19_v20 = vld [vmem:[%s471_s0 + $0x38] sm:$0xff] }
   0xd   :  { %315 = vmatmul.mubr.msk.f32.vlgmr.msra.gmra.mrb[0].mxu1 %vm32_vm0, %v21_v9  ;;  %305 = vmatprep.mubr.msk.f32.mxu0 %vm32_vm0, %v14_v10  ;;  %v27_v21 = vld [vmem:[%s471_s0 + $0x78] sm:$0xff]  ;;  %s365_s0 = smov [#allocation2]  }
   0xe   :  { %317 = vmatprep.mubr.msk.f32.mxu1 %vm32_vm0, %v22_v11  ;;  %s247_s20 = sshll.u32 %s365_s0, 4  ;;  %s248_s20 = int_to_ptr.vmem [resolvable:$true] %s247_s20 }
   0xf   :  { %s341_s1 = scalar_lea.vmem %s248_s20, 2048  ;;  %p346_p1 = scmp.lt.s32.totalorder %s248_s20, %s248_s20 }
  0x10   :  { %306 = vmatmul.mubr.msk.f32.gmra.mrb[2].mxu0 %vm32_vm0, %v15_v12  ;;  %p342_p0 = scmp.ne.s32.totalorder %s248_s20, %s341_s1  ;;  %p347_p2 = scmp.lt.s32.totalorder %s341_s1, %s341_s1 }
  0x11   :  { %318 = vmatmul.mubr.msk.f32.gmra.mrb[2].mxu1 %vm32_vm0, %v23_v13  ;;  %308 = vmatprep.mubr.msk.f32.mxu0 %vm32_vm0, %v16_v14 }
  0x12   :  { %320 = vmatprep.mubr.msk.f32.mxu1 %vm32_vm0, %v24_v15  ;;  %p348_p3 = por %p347_p2, %p346_p1 }
  0x14   :  { %309 = vmatmul.mubr.msk.f32.gmra.mrb[4].mxu0 %vm32_vm0, %v17_v16  ;;  %p349_p4 = pnand %p348_p3, %p342_p0 }
  0x15   :  { %321 = vmatmul.mubr.msk.f32.gmra.mrb[4].mxu1 %vm32_vm0, %v25_v17  ;;  %311 = vmatprep.mubr.msk.f32.mxu0 %vm32_vm0, %v18_v18 }
  0x16   :  { %323 = vmatprep.mubr.msk.f32.mxu1 %vm32_vm0, %v26_v19 }
  0x18   :  { %312 = vmatmul.mubr.msk.f32.gmra.mrb[6].mxu0 %vm32_vm0, %v19_v20 }
  0x19   :  { %324 = vmatmul.mubr.msk.f32.gmra.mrb[6].mxu1 %vm32_vm0, %v27_v21 }
  0xdf   :  { %v304_v22 = vpop.f32.mrb[0].mxu0 }
  0xe0   :  { %v316_v23 = vpop.f32.mrb[0].mxu1  ;;  %227 = vst [vmem:[#allocation2 + $0x8] sm:$0xff] %v304_v22  ;;  %v147_v24 = vpop.f32.mrb[1].mxu0 }
  0xe1   :  { %235 = vst [vmem:[#allocation2 + $0x48] sm:$0xff] %v316_v23  ;;  %v187_v25 = vpop.f32.mrb[1].mxu1  ;;  %226 = vst [vmem:[#allocation2] sm:$0xff] %v147_v24 }
  0xe2   :  { %234 = vst [vmem:[#allocation2 + $0x40] sm:$0xff] %v187_v25 }
  0xe3   :  { %v307_v26 = vpop.f32.mrb[2].mxu0 }
  0xe4   :  { %v319_v27 = vpop.f32.mrb[2].mxu1  ;;  %229 = vst [vmem:[#allocation2 + $0x18] sm:$0xff] %v307_v26  ;;  %v157_v28 = vpop.f32.mrb[3].mxu0 }
  0xe5   :  { %237 = vst [vmem:[#allocation2 + $0x58] sm:$0xff] %v319_v27  ;;  %v197_v29 = vpop.f32.mrb[3].mxu1  ;;  %228 = vst [vmem:[#allocation2 + $0x10] sm:$0xff] %v157_v28 }
  0xe6   :  { %236 = vst [vmem:[#allocation2 + $0x50] sm:$0xff] %v197_v29 }
  0xe7   :  { %v310_v30 = vpop.f32.mrb[4].mxu0 }
  0xe8   :  { %v322_v31 = vpop.f32.mrb[4].mxu1  ;;  %231 = vst [vmem:[#allocation2 + $0x28] sm:$0xff] %v310_v30  ;;  %v167_v32 = vpop.f32.mrb[5].mxu0 }
  0xe9   :  { %239 = vst [vmem:[#allocation2 + $0x68] sm:$0xff] %v322_v31  ;;  %v207_v33 = vpop.f32.mrb[5].mxu1  ;;  %230 = vst [vmem:[#allocation2 + $0x20] sm:$0xff] %v167_v32 }
  0xea   :  { %238 = vst [vmem:[#allocation2 + $0x60] sm:$0xff] %v207_v33 }
  0xeb   :  { %v313_v34 = vpop.f32.mrb[6].mxu0 }
  0xec   :  { %v325_v35 = vpop.f32.mrb[6].mxu1  ;;  %233 = vst [vmem:[#allocation2 + $0x38] sm:$0xff] %v313_v34  ;;  %v177_v36 = vpop.f32.mrb[7].mxu0 }
  0xed   :  { %241 = vst [vmem:[#allocation2 + $0x78] sm:$0xff] %v325_v35  ;;  %v217_v37 = vpop.f32.mrb[7].mxu1  ;;  %232 = vst [vmem:[#allocation2 + $0x30] sm:$0xff] %v177_v36 }
  0xee   :  { %240 = vst [vmem:[#allocation2 + $0x70] sm:$0xff] %v217_v37 }
  0xef   :  { %352 = shalt.err (!%p349_p4)
}
  0xf0   :  { %s353_s23 = scalar_lea.hbm %s473_s2, 2048 }
  0xf1   :  { %p354_p5 = scmp.ne.s32.totalorder %s473_s2, %s353_s23  ;;  %p357_p6 = scmp.lt.u32.totalorder %s353_s23, %s473_s2 }
  0xf3   :  { %p359_p7 = pnand %p357_p6, %p354_p5 }
  0xf5   :  { %362 = shalt.err (!%p359_p7)
}
  0xf6   :  { %s366_s28 = smov 128   ;;  %s367_s29 = smov 8  }
  0xf7   :  { %253 = dma.vmem_to_hbm [thread:$0]  %s248_s20, 2048, %s473_s2, [#allocation3], %s366_s28, %s366_s28, %s367_s29  }
  0xf8   :  { %363 = dma.done.wait [#allocation3], 2048  }
  0xf9   :  { %364 = vsyncadd [#allocation3], 4294965248 }
  0xfa   :  { %257 = vsyncpa [#allocation3], 1 }

</bundles_post_ra>
